<compile_context>
chip_gen: v7x
topology: tpu7x:2x2x1
jax: 0.10.0
libtpu: 0.0.40
codegen_flags: <defaults>
</compile_context>

<pallas_src>
import functools
from types import SimpleNamespace

import jax
import jax.numpy as jnp
from jax import lax
from jax.experimental import pallas as pl
from jax.experimental.pallas import tpu as pltpu


# ----------------------------- fused Pallas kernel ---------------------------

def _generator_kernel(x_ref, adj_ref, w1_ref, b1_ref, w2_ref,
                      inps_ref, wi_ref, bi_ref, wd_ref,
                      logits_ref, exp_ref, es_ref, *, n_valid, unroll):
    f32 = jnp.float32
    bf16 = jnp.bfloat16

    # ---- encoder: es = relu( A_norm @ relu(X @ W1 + b1) @ W2 ) -> (N_pad, H) ----
    # bf16 MXU operands, f32 accumulation; elementwise stays f32.
    h = jnp.dot(x_ref[...], w1_ref[...].astype(bf16), preferred_element_type=f32)
    h = jnp.maximum(h + b1_ref[...], 0.0)
    msg = jnp.dot(adj_ref[...], h.astype(bf16), preferred_element_type=f32)
    es = jnp.maximum(
        jnp.dot(msg.astype(bf16), w2_ref[...].astype(bf16),
                preferred_element_type=f32), 0.0)
    es_ref[...] = es                                   # (N_pad, H) output

    # ---- loop-invariant hoists (transpose, weights, input projection, mask) ----
    es_t = es.T.astype(bf16)                           # (H, N_pad): transposed ONCE
    w_dec = wd_ref[...].astype(bf16)                   # (H, H)
    inp_proj = (
        jnp.dot(inps_ref[...].astype(bf16), wi_ref[...].astype(bf16),
                preferred_element_type=f32)
        + bi_ref[...]
    )                                                  # (B, H), f32

    n_iter, b, n_pad = logits_ref.shape
    col = lax.broadcasted_iota(jnp.int32, (b, n_pad), 1)   # hoisted, built once
    valid = col < n_valid
    neg_inf = jnp.float32(-jnp.inf)

    def step(t, h_state):
        # recurrent expansion state
        h_new = jnp.tanh(
            jnp.dot(h_state.astype(bf16), w_dec, preferred_element_type=f32)
            + inp_proj
        )
        # scores = h_new @ es^T on the MXU (es^T hoisted out of the loop)
        scores = jnp.dot(h_new.astype(bf16), es_t, preferred_element_type=f32)
        scores = jnp.where(valid, scores, neg_inf)     # mask padded node columns
        # stable log-softmax
        m = jnp.max(scores, axis=-1, keepdims=True)
        lse = m + jnp.log(jnp.sum(jnp.exp(scores - m), axis=-1, keepdims=True))
        logits_ref[t] = scores - lse                   # lane-dense (B, N_pad) store
        return h_new

    h0 = jnp.zeros_like(inp_proj)
    lax.fori_loop(0, n_iter, step, h0, unroll=unroll)

    # ---- expansions: one batched argmax over the VMEM-resident logits block ----
    logits_all = logits_ref[...]                       # (n_iter, B, N_pad)
    idx = lax.broadcasted_iota(jnp.int32, logits_all.shape, 2)
    m_all = jnp.max(logits_all, axis=-1, keepdims=True)
    exp_ref[...] = jnp.min(
        jnp.where(logits_all == m_all, idx, n_pad), axis=-1
    ).astype(jnp.int32)                                # single (n_iter, B) store


# ------------------------------- wrapper -------------------------------------

def generator_forward(x, adj, w_enc1, b_enc1, w_enc2,
                      inps, w_inp, b_inp, w_dec, n_iter):
    N, F = x.shape
    H = w_enc1.shape[1]
    B, D = inps.shape

    # Pad node axis to the 128-lane width so logits stores are unmasked full-lane
    # vst's; padded columns are masked to -inf inside the kernel.
    n_pad = ((N + 127) // 128) * 128
    x_p = jnp.pad(x, ((0, n_pad - N), (0, 0))).astype(jnp.bfloat16)
    adj_p = jnp.pad(adj, ((0, n_pad - N), (0, n_pad - N))).astype(jnp.bfloat16)

    # Cap unroll of the recurrence (full unroll only for short loops).
    unroll = n_iter if n_iter <= 8 else 4
    kernel = functools.partial(_generator_kernel, n_valid=N, unroll=unroll)

    def full(shape):
        return pl.BlockSpec(shape, lambda i, _n=len(shape): (0,) * _n)

    logits_p, exps, es_p = pl.pallas_call(
        kernel,
        out_shape=(
            jax.ShapeDtypeStruct((n_iter, B, n_pad), jnp.float32),
            jax.ShapeDtypeStruct((n_iter, B), jnp.int32),
            jax.ShapeDtypeStruct((n_pad, H), jnp.float32),
        ),
        grid_spec=pltpu.PrefetchScalarGridSpec(
            num_scalar_prefetch=0,
            grid=(1,),
            in_specs=[
                full((n_pad, F)),       # x (bf16)
                full((n_pad, n_pad)),   # adj (bf16, row-normalized dense; toy N)
                full((F, H)),           # w_enc1
                full((1, H)),           # b_enc1
                full((H, H)),           # w_enc2
                full((B, D)),           # inps
                full((D, H)),           # w_inp
                full((1, H)),           # b_inp
                full((H, H)),           # w_dec
            ],
            out_specs=[
                full((n_iter, B, n_pad)),   # logits (padded node axis)
                full((n_iter, B)),          # expansions
                full((n_pad, H)),           # es (padded node axis)
            ],
        ),
        compiler_params=pltpu.CompilerParams(
            dimension_semantics=("arbitrary",),
            vmem_limit_bytes=32 * 1024 * 1024),
    )(x_p, adj_p, w_enc1, b_enc1, w_enc2, inps, w_inp, b_inp, w_dec)

    return logits_p[..., :N], exps, es_p[:N]


# ------------------------------ Generator ------------------------------------

class GeneratorPallas:
    """Pallas/JAX stand-in for core/generator.py::Generator (forward only)."""

    def __init__(self, opt, key):
        self.gamma = min(max(0.0, opt["gamma"]), 1.0)
        F, H, D = opt["node_feat_dim"], opt["hidden_dim"], opt["inp_dim"]
        ks = jax.random.split(key, 4)
        s = 0.1
        # encoder params
        self.w_enc1 = s * jax.random.normal(ks[0], (F, H), jnp.float32)
        self.b_enc1 = jnp.zeros((1, H), jnp.float32)
        self.w_enc2 = s * jax.random.normal(ks[1], (H, H), jnp.float32)
        # decoder params
        self.w_inp = s * jax.random.normal(ks[2], (D, H), jnp.float32)
        self.b_inp = jnp.zeros((1, H), jnp.float32)
        self.w_dec = s * jax.random.normal(ks[3], (H, H), jnp.float32)

    @staticmethod
    def _dense_norm_adj(edge_index, num_nodes):
        # glue: row-normalized dense adjacency (with self loops) from edge_index [2, E]
        # TODO(synk): at real graph sizes replace with gather/segment-sum aggregation.
        src, dst = edge_index[0], edge_index[1]
        adj = jnp.zeros((num_nodes, num_nodes), jnp.float32)
        adj = adj.at[dst, src].add(1.0)
        adj = adj + jnp.eye(num_nodes, dtype=jnp.float32)
        deg = jnp.sum(adj, axis=1, keepdims=True)
        return adj / jnp.maximum(deg, 1.0)

    def forward(self, graph_data, inps, n_iter=10):
        edge_index = graph_data.node_edge_index
        x = graph_data.x                                  # [N, F]
        N = x.shape[0]
        adj = self._dense_norm_adj(edge_index, N)         # [N, N]
        return generator_forward(
            x, adj, self.w_enc1, self.b_enc1, self.w_enc2,
            inps, self.w_inp, self.b_inp, self.w_dec, n_iter)


# --------------------------------- main ---------------------------------------

if __name__ == "__main__":
    key = jax.random.PRNGKey(0)
    N, F, H, D, B, n_iter = 16, 32, 32, 32, 8, 4

    opt = {"gamma": 0.99, "node_feat_dim": F, "hidden_dim": H, "inp_dim": D}

    kx, ki, kp = jax.random.split(key, 3)
    x = jax.random.normal(kx, (N, F), jnp.float32)
    # deterministic ring graph (both directions)
    src = jnp.arange(N, dtype=jnp.int32)
    dst = (src + 1) % N
    edge_index = jnp.stack(
        [jnp.concatenate([src, dst]), jnp.concatenate([dst, src])], axis=0
    )  # [2, 2N]
    graph_data = SimpleNamespace(node_edge_index=edge_index, x=x)
    inps = jax.random.normal(ki, (B, D), jnp.float32)

    gen = GeneratorPallas(opt, kp)
    logits, expansions, es = gen.forward(graph_data, inps, n_iter=n_iter)
    jax.block_until_ready((logits, expansions, es))

    assert logits.shape == (n_iter, B, N)
    assert expansions.shape == (n_iter, B)
    assert es.shape == (N, H)
    # sanity: expansions match argmax over logits, log_softmax rows normalize,
    # everything is finite after slicing off the padded node columns
    assert bool(jnp.all(expansions == jnp.argmax(logits, axis=-1)))
    assert bool(jnp.allclose(jnp.sum(jnp.exp(logits), axis=-1), 1.0, atol=1e-4))
    assert bool(jnp.all(jnp.isfinite(logits)))
    assert bool(jnp.all((expansions >= 0) & (expansions < N)))
    print("KERNEL_OK")
</pallas_src>

<mosaic_0001>
module attributes {stable_mosaic.version = 11 : i64} {
  func.func @_generator_kernel(%arg0: i32, %arg1: memref<128x32xbf16, #tpu.memory_space<vmem>>, %arg2: memref<128x128xbf16, #tpu.memory_space<vmem>>, %arg3: memref<32x32xf32, #tpu.memory_space<vmem>>, %arg4: memref<1x32xf32, #tpu.memory_space<vmem>>, %arg5: memref<32x32xf32, #tpu.memory_space<vmem>>, %arg6: memref<8x32xf32, #tpu.memory_space<vmem>>, %arg7: memref<32x32xf32, #tpu.memory_space<vmem>>, %arg8: memref<1x32xf32, #tpu.memory_space<vmem>>, %arg9: memref<32x32xf32, #tpu.memory_space<vmem>>, %arg10: memref<4x8x128xf32, #tpu.memory_space<vmem>>, %arg11: memref<4x8xi32, #tpu.memory_space<vmem>>, %arg12: memref<128x32xf32, #tpu.memory_space<vmem>>) attributes {dimension_semantics = [#tpu.dimension_semantics<arbitrary>], iteration_bounds = array<i64: 1>, scalar_prefetch = 0 : i64, scratch_operands = 0 : i64, tpu.core_type = #tpu.core_type<tc>, window_params = [{pipeline_mode = #tpu.pipeline_mode<synchronous>, transform_indices = @transform_0, window_bounds = array<i64: 128, 32>}, {pipeline_mode = #tpu.pipeline_mode<synchronous>, transform_indices = @transform_1, window_bounds = array<i64: 128, 128>}, {pipeline_mode = #tpu.pipeline_mode<synchronous>, transform_indices = @transform_2, window_bounds = array<i64: 32, 32>}, {pipeline_mode = #tpu.pipeline_mode<synchronous>, transform_indices = @transform_3, window_bounds = array<i64: 1, 32>}, {pipeline_mode = #tpu.pipeline_mode<synchronous>, transform_indices = @transform_4, window_bounds = array<i64: 32, 32>}, {pipeline_mode = #tpu.pipeline_mode<synchronous>, transform_indices = @transform_5, window_bounds = array<i64: 8, 32>}, {pipeline_mode = #tpu.pipeline_mode<synchronous>, transform_indices = @transform_6, window_bounds = array<i64: 32, 32>}, {pipeline_mode = #tpu.pipeline_mode<synchronous>, transform_indices = @transform_7, window_bounds = array<i64: 1, 32>}, {pipeline_mode = #tpu.pipeline_mode<synchronous>, transform_indices = @transform_8, window_bounds = array<i64: 32, 32>}, {pipeline_mode = #tpu.pipeline_mode<synchronous>, transform_indices = @transform_9, window_bounds = array<i64: 4, 8, 128>}, {pipeline_mode = #tpu.pipeline_mode<synchronous>, transform_indices = @transform_10, window_bounds = array<i64: 4, 8>}, {pipeline_mode = #tpu.pipeline_mode<synchronous>, transform_indices = @transform_11, window_bounds = array<i64: 128, 32>}]} {
    %c0 = arith.constant 0 : index
    %c0_0 = arith.constant 0 : index
    %0 = vector.load %arg1[%c0, %c0_0] : memref<128x32xbf16, #tpu.memory_space<vmem>>, vector<128x32xbf16>
    %c0_1 = arith.constant 0 : index
    %c0_2 = arith.constant 0 : index
    %1 = vector.load %arg3[%c0_1, %c0_2] : memref<32x32xf32, #tpu.memory_space<vmem>>, vector<32x32xf32>
    %2 = arith.truncf %1 : vector<32x32xf32> to vector<32x32xbf16>
    %cst = arith.constant dense<0.000000e+00> : vector<128x32xf32>
    %3 = tpu.matmul %0, %2, %cst {dimension_numbers = #tpu.dot_dimension_numbers<[1], [0], [0], [1], [0, 0, 1, 1], [], []>} : vector<128x32xbf16>, vector<32x32xbf16>, vector<128x32xf32> -> vector<128x32xf32>
    %c0_3 = arith.constant 0 : index
    %c0_4 = arith.constant 0 : index
    %4 = vector.load %arg4[%c0_3, %c0_4] : memref<1x32xf32, #tpu.memory_space<vmem>>, vector<1x32xf32>
    %5 = vector.broadcast %4 : vector<1x32xf32> to vector<128x32xf32>
    %6 = arith.addf %3, %5 : vector<128x32xf32>
    %cst_5 = arith.constant 0.000000e+00 : f32
    %7 = vector.broadcast %cst_5 : f32 to vector<128x32xf32>
    %8 = arith.maximumf %6, %7 : vector<128x32xf32>
    %c0_6 = arith.constant 0 : index
    %c0_7 = arith.constant 0 : index
    %9 = vector.load %arg2[%c0_6, %c0_7] : memref<128x128xbf16, #tpu.memory_space<vmem>>, vector<128x128xbf16>
    %10 = arith.truncf %8 : vector<128x32xf32> to vector<128x32xbf16>
    %cst_8 = arith.constant dense<0.000000e+00> : vector<128x32xf32>
    %11 = tpu.matmul %9, %10, %cst_8 {dimension_numbers = #tpu.dot_dimension_numbers<[1], [0], [0], [1], [0, 0, 1, 1], [], []>} : vector<128x128xbf16>, vector<128x32xbf16>, vector<128x32xf32> -> vector<128x32xf32>
    %12 = arith.truncf %11 : vector<128x32xf32> to vector<128x32xbf16>
    %c0_9 = arith.constant 0 : index
    %c0_10 = arith.constant 0 : index
    %13 = vector.load %arg5[%c0_9, %c0_10] : memref<32x32xf32, #tpu.memory_space<vmem>>, vector<32x32xf32>
    %14 = arith.truncf %13 : vector<32x32xf32> to vector<32x32xbf16>
    %cst_11 = arith.constant dense<0.000000e+00> : vector<128x32xf32>
    %15 = tpu.matmul %12, %14, %cst_11 {dimension_numbers = #tpu.dot_dimension_numbers<[1], [0], [0], [1], [0, 0, 1, 1], [], []>} : vector<128x32xbf16>, vector<32x32xbf16>, vector<128x32xf32> -> vector<128x32xf32>
    %cst_12 = arith.constant 0.000000e+00 : f32
    %16 = vector.broadcast %cst_12 : f32 to vector<128x32xf32>
    %17 = arith.maximumf %15, %16 : vector<128x32xf32>
    %c0_13 = arith.constant 0 : index
    %c0_14 = arith.constant 0 : index
    %18 = vector.load %arg12[%c0_13, %c0_14] : memref<128x32xf32, #tpu.memory_space<vmem>>, vector<128x32xf32>
    tpu.vector_store %arg12[%c0_13, %c0_14], %17 {strides = array<i32>} : memref<128x32xf32, #tpu.memory_space<vmem>>, vector<128x32xf32>,
    %19 = tpu.transpose %17, [1, 0] : vector<128x32xf32> -> vector<32x128xf32>
    %20 = arith.truncf %19 : vector<32x128xf32> to vector<32x128xbf16>
    %c0_15 = arith.constant 0 : index
    %c0_16 = arith.constant 0 : index
    %21 = vector.load %arg9[%c0_15, %c0_16] : memref<32x32xf32, #tpu.memory_space<vmem>>, vector<32x32xf32>
    %22 = arith.truncf %21 : vector<32x32xf32> to vector<32x32xbf16>
    %c0_17 = arith.constant 0 : index
    %c0_18 = arith.constant 0 : index
    %23 = vector.load %arg6[%c0_17, %c0_18] : memref<8x32xf32, #tpu.memory_space<vmem>>, vector<8x32xf32>
    %24 = arith.truncf %23 : vector<8x32xf32> to vector<8x32xbf16>
    %c0_19 = arith.constant 0 : index
    %c0_20 = arith.constant 0 : index
    %25 = vector.load %arg7[%c0_19, %c0_20] : memref<32x32xf32, #tpu.memory_space<vmem>>, vector<32x32xf32>
    %26 = arith.truncf %25 : vector<32x32xf32> to vector<32x32xbf16>
    %cst_21 = arith.constant dense<0.000000e+00> : vector<8x32xf32>
    %27 = tpu.matmul %24, %26, %cst_21 {dimension_numbers = #tpu.dot_dimension_numbers<[1], [0], [0], [1], [0, 0, 1, 1], [], []>} : vector<8x32xbf16>, vector<32x32xbf16>, vector<8x32xf32> -> vector<8x32xf32>
    %c0_22 = arith.constant 0 : index
    %c0_23 = arith.constant 0 : index
    %28 = vector.load %arg8[%c0_22, %c0_23] : memref<1x32xf32, #tpu.memory_space<vmem>>, vector<1x32xf32>
    %29 = vector.broadcast %28 : vector<1x32xf32> to vector<8x32xf32>
    %30 = arith.addf %27, %29 : vector<8x32xf32>
    %31 = tpu.iota {dimensions = array<i32: 1>} : vector<8x128xi32>
    %c16_i32 = arith.constant 16 : i32
    %32 = vector.broadcast %c16_i32 : i32 to vector<8x128xi32>
    %33 = arith.cmpi slt, %31, %32 : vector<8x128xi32>
    %cst_24 = arith.constant 0.000000e+00 : f32
    %34 = vector.broadcast %cst_24 : f32 to vector<8x32xf32>
    %cst_25 = arith.constant 0xFF800000 : f32
    %c0_i32 = arith.constant 0 : i32
    %35 = arith.truncf %34 : vector<8x32xf32> to vector<8x32xbf16>
    %cst_26 = arith.constant dense<0.000000e+00> : vector<8x32xf32>
    %36 = tpu.matmul %35, %22, %cst_26 {dimension_numbers = #tpu.dot_dimension_numbers<[1], [0], [0], [1], [0, 0, 1, 1], [], []>} : vector<8x32xbf16>, vector<32x32xbf16>, vector<8x32xf32> -> vector<8x32xf32>
    %37 = arith.addf %36, %30 : vector<8x32xf32>
    %38 = math.tanh %37 : vector<8x32xf32>
    %39 = arith.truncf %38 : vector<8x32xf32> to vector<8x32xbf16>
    %cst_27 = arith.constant dense<0.000000e+00> : vector<8x128xf32>
    %40 = tpu.matmul %39, %20, %cst_27 {dimension_numbers = #tpu.dot_dimension_numbers<[1], [0], [0], [1], [0, 0, 1, 1], [], []>} : vector<8x32xbf16>, vector<32x128xbf16>, vector<8x128xf32> -> vector<8x128xf32>
    %41 = vector.broadcast %cst_25 : f32 to vector<8x128xf32>
    %42 = arith.select %33, %40, %41 : vector<8x128xi1>, vector<8x128xf32>
    %cst_28 = arith.constant dense<0xFF800000> : vector<8xf32>
    %43 = vector.multi_reduction <maximumf>, %42, %cst_28 [1] : vector<8x128xf32> to vector<8xf32>
    %44 = vector.shape_cast %43 : vector<8xf32> to vector<8x1xf32>
    %45 = vector.broadcast %44 : vector<8x1xf32> to vector<8x128xf32>
    %46 = arith.subf %42, %45 : vector<8x128xf32>
    %47 = math.exp %46 : vector<8x128xf32>
    %cst_29 = arith.constant dense<0.000000e+00> : vector<8xf32>
    %48 = vector.multi_reduction <add>, %47, %cst_29 [1] : vector<8x128xf32> to vector<8xf32>
    %49 = vector.shape_cast %48 : vector<8xf32> to vector<8x1xf32>
    %50 = math.log %49 : vector<8x1xf32>
    %51 = arith.addf %44, %50 : vector<8x1xf32>
    %52 = vector.broadcast %51 : vector<8x1xf32> to vector<8x128xf32>
    %53 = arith.subf %42, %52 : vector<8x128xf32>
    %54 = arith.index_cast %c0_i32 : i32 to index
    %c0_30 = arith.constant 0 : index
    %c0_31 = arith.constant 0 : index
    %55 = vector.load %arg10[%54, %c0_30, %c0_31] : memref<4x8x128xf32, #tpu.memory_space<vmem>>, vector<1x8x128xf32>
    %56 = vector.shape_cast %55 : vector<1x8x128xf32> to vector<8x128xf32>
    %57 = vector.shape_cast %53 : vector<8x128xf32> to vector<1x8x128xf32>
    tpu.vector_store %arg10[%54, %c0_30, %c0_31], %57 {strides = array<i32>} : memref<4x8x128xf32, #tpu.memory_space<vmem>>, vector<1x8x128xf32>,
    %c1_i32 = arith.constant 1 : i32
    %58 = arith.truncf %38 : vector<8x32xf32> to vector<8x32xbf16>
    %cst_32 = arith.constant dense<0.000000e+00> : vector<8x32xf32>
    %59 = tpu.matmul %58, %22, %cst_32 {dimension_numbers = #tpu.dot_dimension_numbers<[1], [0], [0], [1], [0, 0, 1, 1], [], []>} : vector<8x32xbf16>, vector<32x32xbf16>, vector<8x32xf32> -> vector<8x32xf32>
    %60 = arith.addf %59, %30 : vector<8x32xf32>
    %61 = math.tanh %60 : vector<8x32xf32>
    %62 = arith.truncf %61 : vector<8x32xf32> to vector<8x32xbf16>
    %cst_33 = arith.constant dense<0.000000e+00> : vector<8x128xf32>
    %63 = tpu.matmul %62, %20, %cst_33 {dimension_numbers = #tpu.dot_dimension_numbers<[1], [0], [0], [1], [0, 0, 1, 1], [], []>} : vector<8x32xbf16>, vector<32x128xbf16>, vector<8x128xf32> -> vector<8x128xf32>
    %64 = vector.broadcast %cst_25 : f32 to vector<8x128xf32>
    %65 = arith.select %33, %63, %64 : vector<8x128xi1>, vector<8x128xf32>
    %cst_34 = arith.constant dense<0xFF800000> : vector<8xf32>
    %66 = vector.multi_reduction <maximumf>, %65, %cst_34 [1] : vector<8x128xf32> to vector<8xf32>
    %67 = vector.shape_cast %66 : vector<8xf32> to vector<8x1xf32>
    %68 = vector.broadcast %67 : vector<8x1xf32> to vector<8x128xf32>
    %69 = arith.subf %65, %68 : vector<8x128xf32>
    %70 = math.exp %69 : vector<8x128xf32>
    %cst_35 = arith.constant dense<0.000000e+00> : vector<8xf32>
    %71 = vector.multi_reduction <add>, %70, %cst_35 [1] : vector<8x128xf32> to vector<8xf32>
    %72 = vector.shape_cast %71 : vector<8xf32> to vector<8x1xf32>
    %73 = math.log %72 : vector<8x1xf32>
    %74 = arith.addf %67, %73 : vector<8x1xf32>
    %75 = vector.broadcast %74 : vector<8x1xf32> to vector<8x128xf32>
    %76 = arith.subf %65, %75 : vector<8x128xf32>
    %77 = arith.index_cast %c1_i32 : i32 to index
    %c0_36 = arith.constant 0 : index
    %c0_37 = arith.constant 0 : index
    %78 = vector.load %arg10[%77, %c0_36, %c0_37] : memref<4x8x128xf32, #tpu.memory_space<vmem>>, vector<1x8x128xf32>
    %79 = vector.shape_cast %78 : vector<1x8x128xf32> to vector<8x128xf32>
    %80 = vector.shape_cast %76 : vector<8x128xf32> to vector<1x8x128xf32>
    tpu.vector_store %arg10[%77, %c0_36, %c0_37], %80 {strides = array<i32>} : memref<4x8x128xf32, #tpu.memory_space<vmem>>, vector<1x8x128xf32>,
    %c2_i32 = arith.constant 2 : i32
    %81 = arith.truncf %61 : vector<8x32xf32> to vector<8x32xbf16>
    %cst_38 = arith.constant dense<0.000000e+00> : vector<8x32xf32>
    %82 = tpu.matmul %81, %22, %cst_38 {dimension_numbers = #tpu.dot_dimension_numbers<[1], [0], [0], [1], [0, 0, 1, 1], [], []>} : vector<8x32xbf16>, vector<32x32xbf16>, vector<8x32xf32> -> vector<8x32xf32>
    %83 = arith.addf %82, %30 : vector<8x32xf32>
    %84 = math.tanh %83 : vector<8x32xf32>
    %85 = arith.truncf %84 : vector<8x32xf32> to vector<8x32xbf16>
    %cst_39 = arith.constant dense<0.000000e+00> : vector<8x128xf32>
    %86 = tpu.matmul %85, %20, %cst_39 {dimension_numbers = #tpu.dot_dimension_numbers<[1], [0], [0], [1], [0, 0, 1, 1], [], []>} : vector<8x32xbf16>, vector<32x128xbf16>, vector<8x128xf32> -> vector<8x128xf32>
    %87 = vector.broadcast %cst_25 : f32 to vector<8x128xf32>
    %88 = arith.select %33, %86, %87 : vector<8x128xi1>, vector<8x128xf32>
    %cst_40 = arith.constant dense<0xFF800000> : vector<8xf32>
    %89 = vector.multi_reduction <maximumf>, %88, %cst_40 [1] : vector<8x128xf32> to vector<8xf32>
    %90 = vector.shape_cast %89 : vector<8xf32> to vector<8x1xf32>
    %91 = vector.broadcast %90 : vector<8x1xf32> to vector<8x128xf32>
    %92 = arith.subf %88, %91 : vector<8x128xf32>
    %93 = math.exp %92 : vector<8x128xf32>
    %cst_41 = arith.constant dense<0.000000e+00> : vector<8xf32>
    %94 = vector.multi_reduction <add>, %93, %cst_41 [1] : vector<8x128xf32> to vector<8xf32>
    %95 = vector.shape_cast %94 : vector<8xf32> to vector<8x1xf32>
    %96 = math.log %95 : vector<8x1xf32>
    %97 = arith.addf %90, %96 : vector<8x1xf32>
    %98 = vector.broadcast %97 : vector<8x1xf32> to vector<8x128xf32>
    %99 = arith.subf %88, %98 : vector<8x128xf32>
    %100 = arith.index_cast %c2_i32 : i32 to index
    %c0_42 = arith.constant 0 : index
    %c0_43 = arith.constant 0 : index
    %101 = vector.load %arg10[%100, %c0_42, %c0_43] : memref<4x8x128xf32, #tpu.memory_space<vmem>>, vector<1x8x128xf32>
    %102 = vector.shape_cast %101 : vector<1x8x128xf32> to vector<8x128xf32>
    %103 = vector.shape_cast %99 : vector<8x128xf32> to vector<1x8x128xf32>
    tpu.vector_store %arg10[%100, %c0_42, %c0_43], %103 {strides = array<i32>} : memref<4x8x128xf32, #tpu.memory_space<vmem>>, vector<1x8x128xf32>,
    %c3_i32 = arith.constant 3 : i32
    %104 = arith.truncf %84 : vector<8x32xf32> to vector<8x32xbf16>
    %cst_44 = arith.constant dense<0.000000e+00> : vector<8x32xf32>
    %105 = tpu.matmul %104, %22, %cst_44 {dimension_numbers = #tpu.dot_dimension_numbers<[1], [0], [0], [1], [0, 0, 1, 1], [], []>} : vector<8x32xbf16>, vector<32x32xbf16>, vector<8x32xf32> -> vector<8x32xf32>
    %106 = arith.addf %105, %30 : vector<8x32xf32>
    %107 = math.tanh %106 : vector<8x32xf32>
    %108 = arith.truncf %107 : vector<8x32xf32> to vector<8x32xbf16>
    %cst_45 = arith.constant dense<0.000000e+00> : vector<8x128xf32>
    %109 = tpu.matmul %108, %20, %cst_45 {dimension_numbers = #tpu.dot_dimension_numbers<[1], [0], [0], [1], [0, 0, 1, 1], [], []>} : vector<8x32xbf16>, vector<32x128xbf16>, vector<8x128xf32> -> vector<8x128xf32>
    %110 = vector.broadcast %cst_25 : f32 to vector<8x128xf32>
    %111 = arith.select %33, %109, %110 : vector<8x128xi1>, vector<8x128xf32>
    %cst_46 = arith.constant dense<0xFF800000> : vector<8xf32>
    %112 = vector.multi_reduction <maximumf>, %111, %cst_46 [1] : vector<8x128xf32> to vector<8xf32>
    %113 = vector.shape_cast %112 : vector<8xf32> to vector<8x1xf32>
    %114 = vector.broadcast %113 : vector<8x1xf32> to vector<8x128xf32>
    %115 = arith.subf %111, %114 : vector<8x128xf32>
    %116 = math.exp %115 : vector<8x128xf32>
    %cst_47 = arith.constant dense<0.000000e+00> : vector<8xf32>
    %117 = vector.multi_reduction <add>, %116, %cst_47 [1] : vector<8x128xf32> to vector<8xf32>
    %118 = vector.shape_cast %117 : vector<8xf32> to vector<8x1xf32>
    %119 = math.log %118 : vector<8x1xf32>
    %120 = arith.addf %113, %119 : vector<8x1xf32>
    %121 = vector.broadcast %120 : vector<8x1xf32> to vector<8x128xf32>
    %122 = arith.subf %111, %121 : vector<8x128xf32>
    %123 = arith.index_cast %c3_i32 : i32 to index
    %c0_48 = arith.constant 0 : index
    %c0_49 = arith.constant 0 : index
    %124 = vector.load %arg10[%123, %c0_48, %c0_49] : memref<4x8x128xf32, #tpu.memory_space<vmem>>, vector<1x8x128xf32>
    %125 = vector.shape_cast %124 : vector<1x8x128xf32> to vector<8x128xf32>
    %126 = vector.shape_cast %122 : vector<8x128xf32> to vector<1x8x128xf32>
    tpu.vector_store %arg10[%123, %c0_48, %c0_49], %126 {strides = array<i32>} : memref<4x8x128xf32, #tpu.memory_space<vmem>>, vector<1x8x128xf32>,
    %c4_i32 = arith.constant 4 : i32
    %c0_50 = arith.constant 0 : index
    %c0_51 = arith.constant 0 : index
    %c0_52 = arith.constant 0 : index
    %127 = vector.load %arg10[%c0_50, %c0_51, %c0_52] : memref<4x8x128xf32, #tpu.memory_space<vmem>>, vector<4x8x128xf32>
    %128 = tpu.iota {dimensions = array<i32: 2>} : vector<4x8x128xi32>
    %cst_53 = arith.constant dense<0xFF800000> : vector<4x8xf32>
    %129 = vector.multi_reduction <maximumf>, %127, %cst_53 [2] : vector<4x8x128xf32> to vector<4x8xf32>
    %130 = vector.shape_cast %129 : vector<4x8xf32> to vector<4x8x1xf32>
    %131 = vector.broadcast %130 : vector<4x8x1xf32> to vector<4x8x128xf32>
    %132 = arith.cmpf oeq, %127, %131 : vector<4x8x128xf32>
    %c128_i32 = arith.constant 128 : i32
    %133 = vector.broadcast %c128_i32 : i32 to vector<4x8x128xi32>
    %134 = arith.select %132, %128, %133 : vector<4x8x128xi1>, vector<4x8x128xi32>
    %cst_54 = arith.constant dense<2147483647> : vector<4x8xi32>
    %135 = vector.multi_reduction <minsi>, %134, %cst_54 [2] : vector<4x8x128xi32> to vector<4x8xi32>
    %c0_55 = arith.constant 0 : index
    %c0_56 = arith.constant 0 : index
    %136 = vector.load %arg11[%c0_55, %c0_56] : memref<4x8xi32, #tpu.memory_space<vmem>>, vector<4x8xi32>
    tpu.vector_store %arg11[%c0_55, %c0_56], %135 {strides = array<i32>} : memref<4x8xi32, #tpu.memory_space<vmem>>, vector<4x8xi32>,
    return
  }
  func.func @transform_0(%arg0: i32) -> (i32, i32) {
    %c0_i32 = arith.constant 0 : i32
    %c0_i32_0 = arith.constant 0 : i32
    %c0_i32_1 = arith.constant 0 : i32
    return %c0_i32, %c0_i32_0 : i32, i32
  }
  func.func @transform_1(%arg0: i32) -> (i32, i32) {
    %c0_i32 = arith.constant 0 : i32
    %c0_i32_0 = arith.constant 0 : i32
    %c0_i32_1 = arith.constant 0 : i32
    return %c0_i32, %c0_i32_0 : i32, i32
  }
  func.func @transform_2(%arg0: i32) -> (i32, i32) {
    %c0_i32 = arith.constant 0 : i32
    %c0_i32_0 = arith.constant 0 : i32
    %c0_i32_1 = arith.constant 0 : i32
    return %c0_i32, %c0_i32_0 : i32, i32
  }
  func.func @transform_3(%arg0: i32) -> (i32, i32) {
    %c0_i32 = arith.constant 0 : i32
    %c0_i32_0 = arith.constant 0 : i32
    %c0_i32_1 = arith.constant 0 : i32
    return %c0_i32, %c0_i32_0 : i32, i32
  }
  func.func @transform_4(%arg0: i32) -> (i32, i32) {
    %c0_i32 = arith.constant 0 : i32
    %c0_i32_0 = arith.constant 0 : i32
    %c0_i32_1 = arith.constant 0 : i32
    return %c0_i32, %c0_i32_0 : i32, i32
  }
  func.func @transform_5(%arg0: i32) -> (i32, i32) {
    %c0_i32 = arith.constant 0 : i32
    %c0_i32_0 = arith.constant 0 : i32
    %c0_i32_1 = arith.constant 0 : i32
    return %c0_i32, %c0_i32_0 : i32, i32
  }
  func.func @transform_6(%arg0: i32) -> (i32, i32) {
    %c0_i32 = arith.constant 0 : i32
    %c0_i32_0 = arith.constant 0 : i32
    %c0_i32_1 = arith.constant 0 : i32
    return %c0_i32, %c0_i32_0 : i32, i32
  }
  func.func @transform_7(%arg0: i32) -> (i32, i32) {
    %c0_i32 = arith.constant 0 : i32
    %c0_i32_0 = arith.constant 0 : i32
    %c0_i32_1 = arith.constant 0 : i32
    return %c0_i32, %c0_i32_0 : i32, i32
  }
  func.func @transform_8(%arg0: i32) -> (i32, i32) {
    %c0_i32 = arith.constant 0 : i32
    %c0_i32_0 = arith.constant 0 : i32
    %c0_i32_1 = arith.constant 0 : i32
    return %c0_i32, %c0_i32_0 : i32, i32
  }
  func.func @transform_9(%arg0: i32) -> (i32, i32, i32) {
    %c0_i32 = arith.constant 0 : i32
    %c0_i32_0 = arith.constant 0 : i32
    %c0_i32_1 = arith.constant 0 : i32
    %c0_i32_2 = arith.constant 0 : i32
    return %c0_i32, %c0_i32_0, %c0_i32_1 : i32, i32, i32
  }
  func.func @transform_10(%arg0: i32) -> (i32, i32) {
    %c0_i32 = arith.constant 0 : i32
    %c0_i32_0 = arith.constant 0 : i32
    %c0_i32_1 = arith.constant 0 : i32
    return %c0_i32, %c0_i32_0 : i32, i32
  }
  func.func @transform_11(%arg0: i32) -> (i32, i32) {
    %c0_i32 = arith.constant 0 : i32
    %c0_i32_0 = arith.constant 0 : i32
    %c0_i32_1 = arith.constant 0 : i32
    return %c0_i32, %c0_i32_0 : i32, i32
  }
}

</mosaic_0001>

<bundles_post_ra>
// kernel: tpu_custom_call.1
= control target key start
LH: loop header
LB: loop body
LE: loop exit
PB: predicated region body
PF: predicated region fallthrough
CT: control target
= control target key end

     0   :  { %17 = vsyncpa [#allocation3], 0  ;;  %s2122_s0 = inlined_call_operand.vmem [shape: bf16[128,32], index: 0, kind: input, shape index: {}]   ;;  %s2123_s1 = inlined_call_operand.vmem [shape: bf16[128,128], index: 1, kind: input, shape index: {}]   ;;  %s2124_s2 = inlined_call_operand.hbm [shape: f32[32,32], index: 2, kind: input, shape index: {}]   ;;  %s2125_s3 = inlined_call_operand.vmem [shape: f32[1,32], index: 3, kind: input, shape index: {}]   ;;  %s2126_s4 = inlined_call_operand.hbm [shape: f32[32,32], index: 4, kind: input, shape index: {}]   ;;  %s2127_s5 = inlined_call_operand.hbm [shape: f32[8,32], index: 5, kind: input, shape index: {}]   ;;  %s2128_s6 = inlined_call_operand.vmem [shape: f32[32,32], index: 6, kind: input, shape index: {}]   ;;  %s2129_s7 = inlined_call_operand.vmem [shape: f32[1,32], index: 7, kind: input, shape index: {}]   ;;  %s2130_s8 = inlined_call_operand.hbm [shape: f32[32,32], index: 8, kind: input, shape index: {}]   ;;  %s2131_s9 = inlined_call_operand.hbm [shape: f32[4,8,128], index: 9, kind: output, shape index: {0}]   ;;  %s2132_s10 = inlined_call_operand.hbm [shape: s32[4,8], index: 10, kind: output, shape index: {1}]   ;;  %s2133_s11 = inlined_call_operand.vmem [shape: f32[128,32], index: 11, kind: output, shape index: {2}]  }
   0x1   :  { %18 = vsyncpa [#allocation6], 0 }
   0x2   :  { %19 = vsyncpa [#allocation9], 0 }
   0x3   :  { %20 = vsyncpa [#allocation4], 0 }
   0x4   :  { %21 = vsyncpa [#allocation12], 0  ;;  %s1712_s17 = smov [#allocation5]   ;;  %s1713_s19 = smov [#allocation2]  }
   0x5   :  { %s45_s18 = sshll.u32 %s1712_s17, 4  ;;  %s31_s20 = sshll.u32 %s1713_s19, 4  ;;  %s46_s18 = int_to_ptr.vmem [resolvable:$true] %s45_s18  ;;  %s1783_s20 = int_to_ptr.vmem [resolvable:$true] %s31_s20 }
   0x6   :  { %s1570_s23 = scalar_lea.hbm %s2126_s4, 512 }
   0x7   :  { %p1571_p0 = scmp.ne.s32.totalorder %s2126_s4, %s1570_s23  ;;  %p1574_p1 = scmp.lt.u32.totalorder %s1570_s23, %s2126_s4 }
   0x9   :  { %p1576_p2 = pnand %p1574_p1, %p1571_p0 }
   0xb   :  { %1579 = shalt.err (!%p1576_p2)
}
   0xc   :  { %s1580_s28 = scalar_lea.vmem %s46_s18, 512  ;;  %p1585_p4 = scmp.lt.s32.totalorder %s46_s18, %s46_s18 }
   0xd   :  { %p1581_p3 = scmp.ne.s32.totalorder %s46_s18, %s1580_s28  ;;  %p1586_p5 = scmp.lt.s32.totalorder %s1580_s28, %s1580_s28 }
   0xf   :  { %p1587_p6 = por %p1586_p5, %p1585_p4 }
  0x11   :  { %p1588_p7 = pnand %p1587_p6, %p1581_p3 }
  0x13   :  { %1591 = shalt.err (!%p1588_p7)
}
  0x14   :  { %s1714_s29 = smov 128   ;;  %s1715_s30 = smov 8  }
  0x15   :  { %51 = dma.hbm_to_vmem [thread:$0]  %s2126_s4, 512, %s46_s18, [#allocation6], %s1714_s29, %s1714_s29, %s1715_s30  }
  0x16   :  { %s1592_s16 = scalar_lea.hbm %s2124_s2, 512 }
  0x17   :  { %p1593_p8 = scmp.ne.s32.totalorder %s2124_s2, %s1592_s16  ;;  %p1596_p9 = scmp.lt.u32.totalorder %s1592_s16, %s2124_s2 }
  0x19   :  { %p1598_p10 = pnand %p1596_p9, %p1593_p8 }
  0x1b   :  { %1601 = shalt.err (!%p1598_p10)
}
  0x1c   :  { %s1602_s23 = scalar_lea.vmem %s1783_s20, 512  ;;  %p1607_p12 = scmp.lt.s32.totalorder %s1783_s20, %s1783_s20 }
  0x1d   :  { %p1603_p11 = scmp.ne.s32.totalorder %s1783_s20, %s1602_s23  ;;  %p1608_p13 = scmp.lt.s32.totalorder %s1602_s23, %s1602_s23 }
  0x1f   :  { %p1609_p0 = por %p1608_p13, %p1607_p12 }
  0x21   :  { %p1610_p1 = pnand %p1609_p0, %p1603_p11 }
  0x23   :  { %1613 = shalt.err (!%p1610_p1)
}
  0x24   :  { %37 = dma.hbm_to_vmem [thread:$0]  %s2124_s2, 512, %s1783_s20, [#allocation3], %s1714_s29, %s1714_s29, %s1715_s30  }
  0x25   :  { %s1716_s24 = smov [#allocation7]   ;;  %s1717_s26 = smov [#allocation8]  }
  0x26   :  { %s58_s25 = sshll.u32 %s1716_s24, 4  ;;  %s71_s27 = sshll.u32 %s1717_s26, 4  ;;  %s59_s25 = int_to_ptr.vmem [resolvable:$true] %s58_s25  ;;  %s1820_s27 = int_to_ptr.vmem [resolvable:$true] %s71_s27 }
  0x27   :  { %s1614_s13 = scalar_lea.hbm %s2127_s5, 128 }
  0x28   :  { %p1615_p2 = scmp.ne.s32.totalorder %s2127_s5, %s1614_s13  ;;  %p1618_p3 = scmp.lt.u32.totalorder %s1614_s13, %s2127_s5 }
  0x2a   :  { %p1620_p4 = pnand %p1618_p3, %p1615_p2 }
  0x2c   :  { %1623 = shalt.err (!%p1620_p4)
}
  0x2d   :  { %s1624_s2 = scalar_lea.vmem %s59_s25, 128  ;;  %p1629_p6 = scmp.lt.s32.totalorder %s59_s25, %s59_s25 }
  0x2e   :  { %p1625_p5 = scmp.ne.s32.totalorder %s59_s25, %s1624_s2  ;;  %p1630_p7 = scmp.lt.s32.totalorder %s1624_s2, %s1624_s2 }
  0x30   :  { %p1631_p8 = por %p1630_p7, %p1629_p6 }
  0x32   :  { %p1632_p9 = pnand %p1631_p8, %p1625_p5 }
  0x34   :  { %1635 = shalt.err (!%p1632_p9)
}
  0x35   :  { %61 = dma.hbm_to_vmem [thread:$0]  %s2127_s5, 128, %s59_s25, [#allocation6]  }
  0x36   :  { %s1636_s23 = scalar_lea.hbm %s2130_s8, 512 }
  0x37   :  { %p1637_p10 = scmp.ne.s32.totalorder %s2130_s8, %s1636_s23  ;;  %p1640_p11 = scmp.lt.u32.totalorder %s1636_s23, %s2130_s8 }
  0x39   :  { %p1642_p12 = pnand %p1640_p11, %p1637_p10 }
  0x3b   :  { %1645 = shalt.err (!%p1642_p12)
}
  0x3c   :  { %s1646_s28 = scalar_lea.vmem %s1820_s27, 512  ;;  %p1651_p0 = scmp.lt.s32.totalorder %s1820_s27, %s1820_s27 }
  0x3d   :  { %p1647_p13 = scmp.ne.s32.totalorder %s1820_s27, %s1646_s28  ;;  %p1652_p1 = scmp.lt.s32.totalorder %s1646_s28, %s1646_s28 }
  0x3f   :  { %p1653_p2 = por %p1652_p1, %p1651_p0 }
  0x41   :  { %p1654_p3 = pnand %p1653_p2, %p1647_p13 }
  0x43   :  { %1657 = shalt.err (!%p1654_p3)
}
  0x44   :  { %77 = dma.hbm_to_vmem [thread:$0]  %s2130_s8, 512, %s1820_s27, [#allocation9], %s1714_s29, %s1714_s29, %s1715_s30  }
  0x45   :  { %1702 = dma.done.wait [#allocation3], 512  }
  0x46   :  { %1703 = vsyncadd [#allocation3], 4294966784 }
  0x47   :  { %1704 = dma.done.wait [#allocation6], 640  }
  0x48   :  { %1705 = vsyncadd [#allocation6], 4294966656 }
  0x49   :  { %1706 = dma.done.wait [#allocation9], 512  }
  0x4a   :  { %1707 = vsyncadd [#allocation9], 4294966784  ;;  %v107_v0 = vld [vmem:[#allocation2] sm:$0xff]  ;;  %v108_v1 = vld [vmem:[#allocation2 + $0x8] sm:$0xff]  ;;  %vm160_vm0 = vcmask 261120   ;;  %vm1719_vm1 = vmmov 0  }
  0x4b   :  { %v109_v2 = vld [vmem:[#allocation2 + $0x10] sm:$0xff]  ;;  %v111_v3 = vpack.c.bf16 %v108_v1, %v107_v0  ;;  %v110_v4 = vld [vmem:[#allocation2 + $0x18] sm:$0xff]  ;;  %v1530_v6 = vld [vmem:[%s2122_s0] sm:$0xff]   ;;  %vm1225_vm11 = vcmask 1041409  }
  0x4c   :  { %v112_v5 = vpack.c.bf16 %v110_v4, %v109_v2  ;;  %1379 = vmatprep.mubr.msk.bf16.mxu0 %vm160_vm0, %v1530_v6  ;;  %v1531_v7 = vld [vmem:[%s2122_s0 + $0x8] sm:$0xff]   ;;  %v1532_v8 = vld [vmem:[%s2122_s0 + $0x10] sm:$0xff]   ;;  %v1533_v9 = vld [vmem:[%s2122_s0 + $0x18] sm:$0xff]  }
  0x4d   :  { %1375 = vmatprep.subr.bf16.mxu0 %v111_v3  ;;  %v1534_v10 = vld [vmem:[%s2122_s0 + $0x20] sm:$0xff]   ;;  %v1535_v11 = vld [vmem:[%s2122_s0 + $0x28] sm:$0xff]   ;;  %v1536_v12 = vld [vmem:[%s2122_s0 + $0x30] sm:$0xff]  }
  0x4e   :  { %1376 = vmatpush3.bf16.msra.mxu0 %v111_v3  ;;  %v1537_v13 = vld [vmem:[%s2122_s0 + $0x38] sm:$0xff]   ;;  %v1538_v14 = vld [vmem:[%s2123_s1] sm:$0xff]   ;;  %v476_v16 = vld [vmem:[#allocation5 + $0x8] sm:$0xff] }
  0x4f   :  { %1377 = vmatprep.subr.bf16.mxu0 %v112_v5  ;;  %1411 = vmatprep.mubr.bf16.mxu1 %v1538_v14  ;;  %v475_v15 = vld [vmem:[#allocation5] sm:$0xff]  ;;  %v477_v17 = vld [vmem:[#allocation5 + $0x10] sm:$0xff]  ;;  %v478_v19 = vld [vmem:[#allocation5 + $0x18] sm:$0xff] }
  0x50   :  { %v479_v18 = vpack.c.bf16 %v476_v16, %v475_v15  ;;  %v480_v20 = vpack.c.bf16 %v478_v19, %v477_v17  ;;  %v1270_v21 = vld [vmem:[%s2125_s3] ss:$0 sm:$0xff]  ;;  %v1539_v14 = vld [vmem:[%s2123_s1 + $0x8] sm:$0xff]   ;;  %v1540_v15 = vld [vmem:[%s2123_s1 + $0x10] sm:$0xff]  }
  0x51   :  { %v1541_v16 = vld [vmem:[%s2123_s1 + $0x18] sm:$0xff]   ;;  %v1542_v17 = vld [vmem:[%s2123_s1 + $0x20] sm:$0xff]   ;;  %v1544_v19 = vld [vmem:[%s2123_s1 + $0x30] sm:$0xff]  }
  0x52   :  { %1378 = vmatpush3.bf16.msra.mxu0 %v112_v5 }
  0x53   :  { %1427 = vmatprep.subr.bf16.mxu0 %v479_v18 }
  0x55   :  { %1380 = vmatmul.mubr.msk.bf16.vlgmr.msra.gmra.mrb[0].mxu0 %vm160_vm0, %v1531_v7 }
  0x56   :  { %1383 = vmatprep.mubr.msk.bf16.mxu0 %vm160_vm0, %v1532_v8  ;;  %1428 = vmatpush3.bf16.msra.mxu0 %v479_v18  ;;  %v1543_v18 = vld [vmem:[%s2123_s1 + $0x28] sm:$0xff]  }
  0x57   :  { %1429 = vmatprep.subr.bf16.mxu0 %v480_v20 }
  0x5a   :  { %1430 = vmatpush3.bf16.msra.mxu0 %v480_v20  ;;  %v1545_v20 = vld [vmem:[%s2123_s1 + $0x38] sm:$0xff]  }
  0x5d   :  { %1384 = vmatmul.mubr.msk.bf16.gmra.mrb[4].mxu0 %vm160_vm0, %v1533_v9 }
  0x5e   :  { %1387 = vmatprep.mubr.msk.bf16.mxu0 %vm160_vm0, %v1534_v10 }
  0x65   :  { %1388 = vmatmul.mubr.msk.bf16.gmra.mrb[8].mxu0 %vm160_vm0, %v1535_v11 }
  0x66   :  { %1391 = vmatprep.mubr.msk.bf16.mxu0 %vm160_vm0, %v1536_v12 }
  0x6d   :  { %1392 = vmatmul.mubr.msk.bf16.gmra.mrb[12].mxu0 %vm160_vm0, %v1537_v13 }
 0x128   :  { %v1381_v22 = vpop.f32.mrb[0].mxu0 }
 0x129   :  { %v228_v23 = vadd.f32 %v1381_v22, %v1270_v21  ;;  %v219_v24 = vpop.f32.mrb[1].mxu0  ;;  %v677_v22 = vld [vmem:[%s2128_s6 + $0x8] sm:$0xff] }
 0x12a   :  { %v220_v25 = vadd.f32 %v1270_v21, %v219_v24  ;;  %v1382_v26 = vpop.f32.mrb[2].mxu0 }
 0x12b   :  { %v231_v27 = vadd.f32 %v1382_v26, %v1270_v21  ;;  %v222_v28 = vpop.f32.mrb[3].mxu0  ;;  %v284_v30 = vmax.f32 %v228_v23, 0.0  ;;  %v1718_v23 = vmov 0.0   ;;  %v679_v26 = vld [vmem:[%s2128_s6 + $0x18] sm:$0xff] }
 0x12c   :  { %v223_v29 = vadd.f32 %v1270_v21, %v222_v28  ;;  %v282_v32 = vmax.f32 %v220_v25, 0.0  ;;  %1455 = vmatprep.subr.bf16.mxu0 %v1718_v23  ;;  %v678_v25 = vld [vmem:[%s2128_s6 + $0x10] sm:$0xff]  ;;  %v674_v28 = vld [vmem:[#allocation7] sm:$0xff] }
 0x12d   :  { %v285_v31 = vmax.f32 %v231_v27, 0.0  ;;  %v681_v27 = vpack.c.bf16 %v679_v26, %v678_v25 }
 0x12e   :  { %v283_v33 = vmax.f32 %v223_v29, 0.0  ;;  %v675_v29 = vpack.c.bf16 %v674_v28, %v674_v28 }
 0x12f   :  { %v315_v34 = vpack.c.bf16 %v285_v31, %v284_v30 }
 0x130   :  { %v1385_v35 = vpop.f32.mrb[4].mxu0  ;;  %v314_v36 = vpack.c.bf16 %v283_v33, %v282_v32  ;;  %v668_v32 = vld [vmem:[#allocation8] sm:$0xff]  ;;  %v669_v33 = vld [vmem:[#allocation8 + $0x8] sm:$0xff] }
 0x131   :  { %v244_v37 = vadd.f32 %v1385_v35, %v1270_v21  ;;  %v235_v38 = vpop.f32.mrb[5].mxu0 }
 0x132   :  { %v236_v39 = vadd.f32 %v1270_v21, %v235_v38  ;;  %v1386_v40 = vpop.f32.mrb[6].mxu0  ;;  %1395 = vmatprep.subr.bf16.mxu1 %v314_v36  ;;  %v1934_v38 = vpack.c.bf16 %v669_v33, %v668_v32 }
 0x133   :  { %v247_v41 = vadd.f32 %v1386_v40, %v1270_v21  ;;  %v238_v42 = vpop.f32.mrb[7].mxu0  ;;  %1396 = vmatpush3.bf16.msra.mxu1 %v314_v36  ;;  %v288_v44 = vmax.f32 %v244_v37, 0.0  ;;  %v671_v40 = vld [vmem:[#allocation8 + $0x18] sm:$0xff] }
 0x134   :  { %v239_v43 = vadd.f32 %v1270_v21, %v238_v42  ;;  %1397 = vmatprep.subr.bf16.mxu1 %v315_v34  ;;  %v286_v46 = vmax.f32 %v236_v39, 0.0  ;;  %v670_v39 = vld [vmem:[#allocation8 + $0x10] sm:$0xff] }
 0x135   :  { %v289_v45 = vmax.f32 %v247_v41, 0.0  ;;  %v1939_v42 = vpack.c.bf16 %v671_v40, %v670_v39 }
 0x136   :  { %v287_v47 = vmax.f32 %v239_v43, 0.0 }
 0x137   :  { %v317_v48 = vpack.c.bf16 %v289_v45, %v288_v44  ;;  %1398 = vmatpush3.bf16.msra.mxu1 %v315_v34 }
 0x138   :  { %v316_v49 = vpack.c.bf16 %v287_v47, %v286_v46  ;;  %v1389_v50 = vpop.f32.mrb[8].mxu0 }
 0x139   :  { %v260_v51 = vadd.f32 %v1389_v50, %v1270_v21  ;;  %v251_v52 = vpop.f32.mrb[9].mxu0 }
 0x13a   :  { %v252_v53 = vadd.f32 %v1270_v21, %v251_v52  ;;  %v1390_v54 = vpop.f32.mrb[10].mxu0  ;;  %1399 = vmatprep.subr.bf16.mxu1 %v316_v49 }
 0x13b   :  { %v263_v55 = vadd.f32 %v1390_v54, %v1270_v21  ;;  %v254_v56 = vpop.f32.mrb[11].mxu0  ;;  %1400 = vmatpush3.bf16.msra.mxu1 %v316_v49  ;;  %v292_v58 = vmax.f32 %v260_v51, 0.0 }
 0x13c   :  { %v255_v57 = vadd.f32 %v1270_v21, %v254_v56  ;;  %1401 = vmatprep.subr.bf16.mxu1 %v317_v48  ;;  %v290_v60 = vmax.f32 %v252_v53, 0.0 }
 0x13d   :  { %v293_v59 = vmax.f32 %v263_v55, 0.0 }
 0x13e   :  { %v291_v61 = vmax.f32 %v255_v57, 0.0 }
 0x13f   :  { %v319_v62 = vpack.c.bf16 %v293_v59, %v292_v58  ;;  %1402 = vmatpush3.bf16.msra.mxu1 %v317_v48 }
 0x140   :  { %v318_v63 = vpack.c.bf16 %v291_v61, %v290_v60  ;;  %v1393_v0 = vpop.f32.mrb[12].mxu0  ;;  %v1720_v60 = vmov 0  }
 0x141   :  { %v276_v1 = vadd.f32 %v1393_v0, %v1270_v21  ;;  %v267_v2 = vpop.f32.mrb[13].mxu0 }
 0x142   :  { %v268_v3 = vadd.f32 %v1270_v21, %v267_v2  ;;  %v1394_v4 = vpop.f32.mrb[14].mxu0  ;;  %1403 = vmatprep.subr.bf16.mxu1 %v318_v63 }
 0x143   :  { %v279_v5 = vadd.f32 %v1394_v4, %v1270_v21  ;;  %v270_v6 = vpop.f32.mrb[15].mxu0  ;;  %1404 = vmatpush3.bf16.msra.mxu1 %v318_v63  ;;  %v296_v8 = vmax.f32 %v276_v1, 0.0 }
 0x144   :  { %v271_v7 = vadd.f32 %v1270_v21, %v270_v6  ;;  %1405 = vmatprep.subr.bf16.mxu1 %v319_v62  ;;  %v294_v10 = vmax.f32 %v268_v3, 0.0  ;;  %v676_v21 = vld [vmem:[%s2128_s6] sm:$0xff] }
 0x145   :  { %v297_v9 = vmax.f32 %v279_v5, 0.0  ;;  %v680_v24 = vpack.c.bf16 %v677_v22, %v676_v21 }
 0x146   :  { %v295_v11 = vmax.f32 %v271_v7, 0.0 }
 0x147   :  { %v321_v12 = vpack.c.bf16 %v297_v9, %v296_v8  ;;  %1406 = vmatpush3.bf16.msra.mxu1 %v319_v62 }
 0x148   :  { %v320_v13 = vpack.c.bf16 %v295_v11, %v294_v10 }
 0x14a   :  { %1407 = vmatprep.subr.bf16.mxu1 %v320_v13 }
 0x14b   :  { %1408 = vmatpush3.bf16.msra.mxu1 %v320_v13 }
 0x14c   :  { %1409 = vmatprep.subr.bf16.mxu1 %v321_v12 }
 0x14f   :  { %1410 = vmatpush3.bf16.msra.mxu1 %v321_v12 }
 0x150   :  { %1447 = vmatprep.subr.bf16.mxu1 %v1718_v23 }
 0x152   :  { %1412 = vmatmul.mubr.bf16.vlgmr.msra.gmra.mrb[0].mxu1 %v1539_v14 }
 0x153   :  { %1415 = vmatprep.mubr.bf16.mxu1 %v1540_v15  ;;  %1448 = vmatpush3.bf16.msra.mxu1 %v680_v24 }
 0x154   :  { %1449 = vmatprep.subr.bf16.mxu1 %v1718_v23 }
 0x157   :  { %1450 = vmatpush3.bf16.msra.mxu1 %v681_v27 }
 0x158   :  { %1463 = vmatprep.subr.bf16.mxu1 %v1718_v23 }
 0x15a   :  { %1416 = vmatmul.mubr.bf16.gmra.mrb[4].mxu1 %v1541_v16 }
 0x15b   :  { %1419 = vmatprep.mubr.bf16.mxu1 %v1542_v17 }
 0x162   :  { %1420 = vmatmul.mubr.bf16.gmra.mrb[8].mxu1 %v1543_v18 }
 0x163   :  { %1423 = vmatprep.mubr.bf16.mxu1 %v1544_v19 }
 0x16a   :  { %1424 = vmatmul.mubr.bf16.gmra.mrb[12].mxu1 %v1545_v20 }
 0x16b   :  { %1451 = vmatprep.mubr.msk.bf16.mxu1 %vm1719_vm1, %v1718_v23 }
 0x172   :  { %1452 = vmatmul.mubr.msk.bf16.vlgmr.msra.gmra.mrb[16].mxu1 %vm160_vm0, %v675_v29 }
 0x173   :  { %1467 = vmatprep.mubr.msk.bf16.mxu1 %vm1719_vm1, %v1718_v23 }
 0x225   :  { %v1413_v30 = vpop.f32.mrb[0].mxu1 }
 0x226   :  { %v404_v31 = vpop.f32.mrb[1].mxu1 }
 0x227   :  { %v1414_v34 = vpop.f32.mrb[2].mxu1 }
 0x228   :  { %v468_v35 = vpack.c.bf16 %v1414_v34, %v1413_v30  ;;  %v407_v36 = vpop.f32.mrb[3].mxu1 }
 0x229   :  { %v467_v37 = vpack.c.bf16 %v407_v36, %v404_v31  ;;  %v1303_v31 = vld [vmem:[%s2129_s7] ss:$0 sm:$0xff] }
 0x22b   :  { %1431 = vmatprep.mubr.msk.bf16.mxu0 %vm160_vm0, %v467_v37 }
 0x22c   :  { %1432 = vmatmul.mubr.msk.bf16.vlgmr.msra.gmra.mrb[16].mxu0 %vm160_vm0, %v468_v35 }
 0x22d   :  { %1456 = vmatpush3.bf16.msra.mxu0 %v1934_v38  ;;  %v1417_v41 = vpop.f32.mrb[4].mxu1 }
 0x22e   :  { %v420_v43 = vpop.f32.mrb[5].mxu1  ;;  %1457 = vmatprep.subr.bf16.mxu0 %v1718_v23 }
 0x22f   :  { %v1418_v44 = vpop.f32.mrb[6].mxu1 }
 0x230   :  { %v470_v45 = vpack.c.bf16 %v1418_v44, %v1417_v41  ;;  %v423_v46 = vpop.f32.mrb[7].mxu1 }
 0x231   :  { %v469_v47 = vpack.c.bf16 %v423_v46, %v420_v43  ;;  %1458 = vmatpush3.bf16.msra.mxu0 %v1939_v42 }
 0x232   :  { %1471 = vmatprep.subr.bf16.mxu0 %v1718_v23 }
 0x233   :  { %1435 = vmatprep.mubr.msk.bf16.mxu0 %vm160_vm0, %v469_v47 }
 0x234   :  { %1436 = vmatmul.mubr.msk.bf16.gmra.mrb[20].mxu0 %vm160_vm0, %v470_v45 }
 0x235   :  { %v1421_v48 = vpop.f32.mrb[8].mxu1 }
 0x236   :  { %v436_v49 = vpop.f32.mrb[9].mxu1 }
 0x237   :  { %v1422_v50 = vpop.f32.mrb[10].mxu1 }
 0x238   :  { %v472_v51 = vpack.c.bf16 %v1422_v50, %v1421_v48  ;;  %v439_v52 = vpop.f32.mrb[11].mxu1 }
 0x239   :  { %v471_v53 = vpack.c.bf16 %v439_v52, %v436_v49 }
 0x23b   :  { %1439 = vmatprep.mubr.msk.bf16.mxu0 %vm160_vm0, %v471_v53 }
 0x23c   :  { %1440 = vmatmul.mubr.msk.bf16.gmra.mrb[24].mxu0 %vm160_vm0, %v472_v51 }
 0x23d   :  { %v1425_v54 = vpop.f32.mrb[12].mxu1 }
 0x23e   :  { %v452_v55 = vpop.f32.mrb[13].mxu1 }
 0x23f   :  { %v1426_v56 = vpop.f32.mrb[14].mxu1 }
 0x240   :  { %v474_v57 = vpack.c.bf16 %v1426_v56, %v1425_v54  ;;  %v455_v58 = vpop.f32.mrb[15].mxu1 }
 0x241   :  { %v473_v59 = vpack.c.bf16 %v455_v58, %v452_v55  ;;  %v732_v58 = vlaneseq }
 0x243   :  { %1443 = vmatprep.mubr.msk.bf16.mxu0 %vm160_vm0, %v473_v59  ;;  %v2055_v59 = vand.u32 127, %v732_v58 }
 0x244   :  { %1444 = vmatmul.mubr.msk.bf16.gmra.mrb[28].mxu0 %vm160_vm0, %v474_v57 }
 0x245   :  { %1459 = vmatprep.mubr.msk.bf16.mxu0 %vm1719_vm1, %v1718_v23  ;;  %v726_v61 = vpop.f32.mrb[16].mxu1  ;;  %vm734_vm2 = vcmp.lt.s32.totalorder %v2055_v59, 16 }
 0x246   :  { %v1453_v62 = vpop.f32.mrb[17].mxu1  ;;  %v2021_v35 = vadd.f32 %v1303_v31, %v726_v61 }
 0x247   :  { %v729_v63 = vpop.f32.mrb[18].mxu1 }
 0x248   :  { %v1454_v0 = vpop.f32.mrb[19].mxu1 }
 0x24c   :  { %1460 = vmatmul.mubr.bf16.vlgmr.msra.gmra.mrb[32].mxu0 %v1720_v60 }
 0x24d   :  { %1472 = vmatpush3.bf16.msra.mxu0 %v1934_v38  ;;  %1475 = vmatprep.mubr.msk.bf16.mxu0 %vm1719_vm1, %v1718_v23 }
 0x24e   :  { %1473 = vmatprep.subr.bf16.mxu0 %v1718_v23 }
 0x251   :  { %1474 = vmatpush3.bf16.msra.mxu0 %v1939_v42 }
 0x252   :  { %1487 = vmatprep.subr.bf16.mxu0 %v1718_v23 }
 0x2ff   :  { %v1433_v1 = vpop.f32.mrb[16].mxu0 }
 0x300   :  { %v604_v2 = vmax.f32 %v1433_v1, 0.0  ;;  %v539_v3 = vpop.f32.mrb[17].mxu0 }
 0x301   :  { %v602_v4 = vmax.f32 %v539_v3, 0.0  ;;  %v1434_v5 = vpop.f32.mrb[18].mxu0 }
 0x302   :  { %620 = vst.msk [vmem:[%s2133_s11 + $0x10] sm:$0xff] %vm160_vm0, %v604_v2  ;;  %v605_v6 = vmax.f32 %v1434_v5, 0.0  ;;  %v542_v7 = vpop.f32.mrb[19].mxu0 }
 0x303   :  { %618 = vst.msk [vmem:[%s2133_s11] sm:$0xff] %vm160_vm0, %v602_v4  ;;  %v603_v8 = vmax.f32 %v542_v7, 0.0  ;;  %634 = vxpose.xlu0.b32.start [1/16] (narrow) %v602_v4, 32 }
 0x304   :  { %621 = vst.msk [vmem:[%s2133_s11 + $0x18] sm:$0xff] %vm160_vm0, %v605_v6 }
 0x305   :  { %619 = vst.msk [vmem:[%s2133_s11 + $0x8] sm:$0xff] %vm160_vm0, %v603_v8 }
 0x307   :  { %635 = vxpose.xlu0.b32.cont [2/16] (narrow) %v603_v8, 32  ;;  %v1437_v9 = vpop.f32.mrb[20].mxu0 }
 0x308   :  { %v608_v10 = vmax.f32 %v1437_v9, 0.0  ;;  %v555_v11 = vpop.f32.mrb[21].mxu0 }
 0x309   :  { %v606_v12 = vmax.f32 %v555_v11, 0.0  ;;  %v1438_v13 = vpop.f32.mrb[22].mxu0 }
 0x30a   :  { %624 = vst.msk [vmem:[%s2133_s11 + $0x30] sm:$0xff] %vm160_vm0, %v608_v10  ;;  %v609_v14 = vmax.f32 %v1438_v13, 0.0  ;;  %v558_v15 = vpop.f32.mrb[23].mxu0 }
 0x30b   :  { %622 = vst.msk [vmem:[%s2133_s11 + $0x20] sm:$0xff] %vm160_vm0, %v606_v12  ;;  %v607_v16 = vmax.f32 %v558_v15, 0.0  ;;  %636 = vxpose.xlu0.b32.cont [3/16] (narrow) %v604_v2, 32 }
 0x30c   :  { %625 = vst.msk [vmem:[%s2133_s11 + $0x38] sm:$0xff] %vm160_vm0, %v609_v14 }
 0x30d   :  { %623 = vst.msk [vmem:[%s2133_s11 + $0x28] sm:$0xff] %vm160_vm0, %v607_v16 }
 0x30f   :  { %637 = vxpose.xlu0.b32.cont [4/16] (narrow) %v605_v6, 32  ;;  %v1441_v17 = vpop.f32.mrb[24].mxu0 }
 0x310   :  { %v612_v18 = vmax.f32 %v1441_v17, 0.0  ;;  %v571_v19 = vpop.f32.mrb[25].mxu0 }
 0x311   :  { %v610_v20 = vmax.f32 %v571_v19, 0.0  ;;  %v1442_v21 = vpop.f32.mrb[26].mxu0 }
 0x312   :  { %628 = vst.msk [vmem:[%s2133_s11 + $0x50] sm:$0xff] %vm160_vm0, %v612_v18  ;;  %v613_v22 = vmax.f32 %v1442_v21, 0.0  ;;  %v574_v24 = vpop.f32.mrb[27].mxu0 }
 0x313   :  { %626 = vst.msk [vmem:[%s2133_s11 + $0x40] sm:$0xff] %vm160_vm0, %v610_v20  ;;  %v611_v25 = vmax.f32 %v574_v24, 0.0  ;;  %638 = vxpose.xlu0.b32.cont [5/16] (narrow) %v606_v12, 32 }
 0x314   :  { %629 = vst.msk [vmem:[%s2133_s11 + $0x58] sm:$0xff] %vm160_vm0, %v613_v22 }
 0x315   :  { %627 = vst.msk [vmem:[%s2133_s11 + $0x48] sm:$0xff] %vm160_vm0, %v611_v25 }
 0x317   :  { %639 = vxpose.xlu0.b32.cont [6/16] (narrow) %v607_v16, 32  ;;  %v1445_v26 = vpop.f32.mrb[28].mxu0 }
 0x318   :  { %v616_v27 = vmax.f32 %v1445_v26, 0.0  ;;  %v587_v28 = vpop.f32.mrb[29].mxu0 }
 0x319   :  { %v614_v29 = vmax.f32 %v587_v28, 0.0  ;;  %v1446_v30 = vpop.f32.mrb[30].mxu0 }
 0x31a   :  { %632 = vst.msk [vmem:[%s2133_s11 + $0x70] sm:$0xff] %vm160_vm0, %v616_v27  ;;  %v617_v32 = vmax.f32 %v1446_v30, 0.0  ;;  %v590_v33 = vpop.f32.mrb[31].mxu0 }
 0x31b   :  { %630 = vst.msk [vmem:[%s2133_s11 + $0x60] sm:$0xff] %vm160_vm0, %v614_v29  ;;  %v615_v34 = vmax.f32 %v590_v33, 0.0  ;;  %640 = vxpose.xlu0.b32.cont [7/16] (narrow) %v608_v10, 32 }
 0x31c   :  { %633 = vst.msk [vmem:[%s2133_s11 + $0x78] sm:$0xff] %vm160_vm0, %v617_v32 }
 0x31d   :  { %631 = vst.msk [vmem:[%s2133_s11 + $0x68] sm:$0xff] %vm160_vm0, %v615_v34  ;;  %s1721_s11 = smov [#allocation10]  }
 0x31e   :  { %s1238_s8 = sshll.u32 %s1721_s11, 4  ;;  %s1239_s8 = int_to_ptr.vmem [resolvable:$true] %s1238_s8 }
 0x31f   :  { %641 = vxpose.xlu0.b32.cont [8/16] (narrow) %v609_v14, 32  ;;  %v772_v36 = vpop.f32.mrb[32].mxu0  ;;  %s1658_s27 = scalar_lea.vmem %s1239_s8, 512  ;;  %p1663_p5 = scmp.lt.s32.totalorder %s1239_s8, %s1239_s8 }
 0x320   :  { %v773_v37 = vadd.f32 %v772_v36, %v2021_v35  ;;  %v1461_v39 = vpop.f32.mrb[33].mxu0  ;;  %p1659_p4 = scmp.ne.s32.totalorder %s1239_s8, %s1658_s27  ;;  %p1664_p6 = scmp.lt.s32.totalorder %s1658_s27, %s1658_s27 }
 0x321   :  { %v775_v40 = vpop.f32.mrb[34].mxu0 }
 0x322   :  { %1546 = vtanh.f32 %v773_v37  ;;  %v1462_v41 = vpop.f32.mrb[35].mxu0  ;;  %p1665_p7 = por %p1664_p6, %p1663_p5 }
 0x323   :  { %642 = vxpose.xlu0.b32.cont [9/16] (narrow) %v610_v20, 32 }
 0x324   :  { %p1666_p8 = pnand %p1665_p7, %p1659_p4 }
 0x327   :  { %643 = vxpose.xlu0.b32.cont [10/16] (narrow) %v611_v25, 32 }
 0x32b   :  { %644 = vxpose.xlu0.b32.cont [11/16] (narrow) %v612_v18, 32 }
 0x32c   :  { %v1547_v43 = vpop.eup %1546 }
 0x32d   :  { %v779_v44 = vpack.c.bf16 %v1547_v43, %v1547_v43 }
 0x32f   :  { %645 = vxpose.xlu0.b32.cont [12/16] (narrow) %v613_v22, 32  ;;  %1476 = vmatmul.mubr.msk.bf16.vlgmr.msra.gmra.mrb[36].mxu0 %vm160_vm0, %v779_v44 }
 0x330   :  { %1488 = vmatpush3.bf16.msra.mxu0 %v1934_v38  ;;  %1491 = vmatprep.mubr.msk.bf16.mxu0 %vm1719_vm1, %v1718_v23 }
 0x331   :  { %1489 = vmatprep.subr.bf16.mxu0 %v1718_v23 }
 0x333   :  { %646 = vxpose.xlu0.b32.cont [13/16] (narrow) %v614_v29, 32 }
 0x334   :  { %1490 = vmatpush3.bf16.msra.mxu0 %v1939_v42 }
 0x335   :  { %1503 = vmatprep.subr.bf16.mxu0 %v1718_v23 }
 0x337   :  { %647 = vxpose.xlu0.b32.cont [14/16] (narrow) %v615_v34, 32 }
 0x33b   :  { %648 = vxpose.xlu0.b32.cont [15/16] (narrow) %v616_v27, 32 }
 0x33f   :  { %649 = vxpose.xlu0.b32.end [16/16] (narrow) %v617_v32, 32 }
 0x383   :  { %v650_v45 = vpop.trf.xlu0 }
 0x387   :  { %v651_v46 = vpop.trf.xlu0 }
 0x388   :  { %v666_v47 = vpack.c.bf16 %v651_v46, %v650_v45 }
 0x38a   :  { %1464 = vmatpush3.bf16.msra.mxu1 %v666_v47 }
 0x38b   :  { %v652_v48 = vpop.trf.xlu0  ;;  %1465 = vmatprep.subr.bf16.mxu1 %v1718_v23 }
 0x38f   :  { %v653_v49 = vpop.trf.xlu0 }
 0x390   :  { %v667_v50 = vpack.c.bf16 %v653_v49, %v652_v48 }
 0x392   :  { %1466 = vmatpush3.bf16.msra.mxu1 %v667_v50 }
 0x393   :  { %1479 = vmatprep.subr.bf16.mxu1 %v1718_v23 }
 0x395   :  { %1468 = vmatmul.mubr.msk.bf16.vlgmr.msra.gmra.mrb[20].mxu1 %vm160_vm0, %v779_v44 }
 0x396   :  { %1480 = vmatpush3.bf16.msra.mxu1 %v666_v47  ;;  %1483 = vmatprep.mubr.msk.bf16.mxu1 %vm1719_vm1, %v1718_v23 }
 0x397   :  { %1481 = vmatprep.subr.bf16.mxu1 %v1718_v23 }
 0x39a   :  { %1482 = vmatpush3.bf16.msra.mxu1 %v667_v50 }
 0x39b   :  { %1495 = vmatprep.subr.bf16.mxu1 %v1718_v23 }
 0x402   :  { %v870_v51 = vpop.f32.mrb[36].mxu0 }
 0x403   :  { %v871_v52 = vadd.f32 %v870_v51, %v2021_v35  ;;  %v1477_v53 = vpop.f32.mrb[37].mxu0 }
 0x404   :  { %v873_v54 = vpop.f32.mrb[38].mxu0 }
 0x405   :  { %1548 = vtanh.f32 %v871_v52  ;;  %v1478_v55 = vpop.f32.mrb[39].mxu0 }
 0x40f   :  { %v1549_v56 = vpop.eup %1548 }
 0x410   :  { %v877_v57 = vpack.c.bf16 %v1549_v56, %v1549_v56 }
 0x412   :  { %1484 = vmatmul.mubr.msk.bf16.vlgmr.msra.gmra.mrb[24].mxu1 %vm160_vm0, %v877_v57  ;;  %1492 = vmatmul.mubr.msk.bf16.vlgmr.msra.gmra.mrb[40].mxu0 %vm160_vm0, %v877_v57 }
 0x413   :  { %1504 = vmatpush3.bf16.msra.mxu0 %v1934_v38  ;;  %1496 = vmatpush3.bf16.msra.mxu1 %v666_v47 }
 0x414   :  { %1505 = vmatprep.subr.bf16.mxu0 %v1718_v23  ;;  %1497 = vmatprep.subr.bf16.mxu1 %v1718_v23 }
 0x415   :  { %1499 = vmatprep.mubr.msk.bf16.mxu1 %vm1719_vm1, %v1718_v23  ;;  %1507 = vmatprep.mubr.msk.bf16.mxu0 %vm1719_vm1, %v1718_v23 }
 0x417   :  { %1506 = vmatpush3.bf16.msra.mxu0 %v1939_v42  ;;  %1498 = vmatpush3.bf16.msra.mxu1 %v667_v50 }
 0x418   :  { %1511 = vmatprep.subr.bf16.mxu1 %v1718_v23 }
 0x468   :  { %v817_v38 = vpop.f32.mrb[20].mxu1 }
 0x469   :  { %v2060_v60 = vsel %vm734_vm2, %v817_v38, -inf  ;;  %v1469_v61 = vpop.f32.mrb[21].mxu1 }
 0x46a   :  { %824 = vmax.xlane.f32.xlu1 %v2060_v60  ;;  %v820_v62 = vpop.f32.mrb[22].mxu1 }
 0x46b   :  { %v1470_v63 = vpop.f32.mrb[23].mxu1 }
 0x4e5   :  { %v915_v42 = vpop.f32.mrb[24].mxu1  ;;  %v969_v0 = vpop.f32.mrb[40].mxu0 }
 0x4e6   :  { %v2065_v1 = vsel %vm734_vm2, %v915_v42, -inf  ;;  %v970_v2 = vadd.f32 %v969_v0, %v2021_v35  ;;  %v1485_v3 = vpop.f32.mrb[25].mxu1  ;;  %v1493_v4 = vpop.f32.mrb[41].mxu0 }
 0x4e7   :  { %v972_v5 = vpop.f32.mrb[42].mxu0  ;;  %922 = vmax.xlane.f32.xlu1 %v2065_v1  ;;  %v918_v6 = vpop.f32.mrb[26].mxu1 }
 0x4e8   :  { %1550 = vtanh.f32 %v970_v2  ;;  %v1486_v7 = vpop.f32.mrb[27].mxu1  ;;  %v1494_v8 = vpop.f32.mrb[43].mxu0 }
 0x4f2   :  { %v1551_v9 = vpop.eup %1550 }
 0x4f3   :  { %v976_v10 = vpack.c.bf16 %v1551_v9, %v1551_v9 }
 0x4f5   :  { %1500 = vmatmul.mubr.msk.bf16.vlgmr.msra.gmra.mrb[28].mxu1 %vm160_vm0, %v976_v10  ;;  %1508 = vmatmul.mubr.msk.bf16.vlgmr.msra.gmra.mrb[44].mxu0 %vm160_vm0, %v976_v10 }
 0x4f6   :  { %1512 = vmatpush3.bf16.msra.mxu1 %v666_v47  ;;  %1515 = vmatprep.mubr.msk.bf16.mxu1 %vm1719_vm1, %v1718_v23 }
 0x4f7   :  { %1513 = vmatprep.subr.bf16.mxu1 %v1718_v23  ;;  %v825_v22 = vpop.xlane.xlu1 %824 }
 0x4f8   :  { %v826_v24 = vsub.f32 %v2060_v60, %v825_v22 }
 0x4fa   :  { %1514 = vmatpush3.bf16.msra.mxu1 %v667_v50  ;;  %v827_v26 = vmul.f32 1.442695, %v826_v24 }
 0x574   :  { %v923_v25 = vpop.xlane.xlu1 %922 }
 0x575   :  { %v924_v27 = vsub.f32 %v2065_v1, %v923_v25 }
 0x577   :  { %v925_v29 = vmul.f32 1.442695, %v924_v27 }
 0x5c8   :  { %v1014_v11 = vpop.f32.mrb[28].mxu1  ;;  %v1068_v12 = vpop.f32.mrb[44].mxu0 }
 0x5c9   :  { %v2076_v13 = vsel %vm734_vm2, %v1014_v11, -inf  ;;  %v1069_v14 = vadd.f32 %v1068_v12, %v2021_v35  ;;  %v1501_v15 = vpop.f32.mrb[29].mxu1  ;;  %v1509_v16 = vpop.f32.mrb[45].mxu0 }
 0x5ca   :  { %v1071_v17 = vpop.f32.mrb[46].mxu0  ;;  %1021 = vmax.xlane.f32.xlu1 %v2076_v13  ;;  %v1017_v18 = vpop.f32.mrb[30].mxu1 }
 0x5cb   :  { %1552 = vtanh.f32 %v1069_v14  ;;  %v1502_v19 = vpop.f32.mrb[31].mxu1  ;;  %v1510_v20 = vpop.f32.mrb[47].mxu0 }
 0x5cc   :  { %1554 = vpow2.f32 %v827_v26 }
 0x5cd   :  { %1556 = vpow2.f32 %v925_v29 }
 0x5d5   :  { %v1553_v21 = vpop.eup %1552 }
 0x5d6   :  { %v1075_v23 = vpack.c.bf16 %v1553_v21, %v1553_v21  ;;  %v1555_v37 = vpop.eup %1554 }
 0x5d7   :  { %v1557_v39 = vpop.eup %1556 }
 0x5d8   :  { %1516 = vmatmul.mubr.msk.bf16.vlgmr.msra.gmra.mrb[32].mxu1 %vm160_vm0, %v1075_v23 }
 0x657   :  { %v1022_v28 = vpop.xlane.xlu1 %1021 }
 0x658   :  { %v1023_v30 = vsub.f32 %v2076_v13, %v1022_v28 }
 0x65a   :  { %v1024_v31 = vmul.f32 1.442695, %v1023_v30 }
 0x65c   :  { %1558 = vpow2.f32 %v1024_v31 }
 0x666   :  { %v1559_v40 = vpop.eup %1558 }
 0x6ab   :  { %v1113_v32 = vpop.f32.mrb[32].mxu1 }
 0x6ac   :  { %v1119_v33 = vsel %vm734_vm2, %v1113_v32, -inf  ;;  %v1517_v34 = vpop.f32.mrb[33].mxu1 }
 0x6ad   :  { %1120 = vmax.xlane.f32.xlu1 %v1119_v33  ;;  %v1116_v35 = vpop.f32.mrb[34].mxu1 }
 0x6ae   :  { %v1518_v36 = vpop.f32.mrb[35].mxu1 }
 0x6af   :  { %v1210_v36 = vshrl.u32 %v732_v58, 7 }
 0x6b1   :  { %829 = vadd.xlane.f32.xlu1 %v1555_v37 }
 0x6b5   :  { %927 = vadd.xlane.f32.xlu1 %v1557_v39 }
 0x6b9   :  { %1026 = vadd.xlane.f32.xlu1 %v1559_v40 }
 0x73a   :  { %v1121_v41 = vpop.xlane.xlu1 %1120 }
 0x73b   :  { %v1122_v43 = vsub.f32 %v1119_v33, %v1121_v41 }
 0x73d   :  { %v1123_v44 = vmul.f32 1.442695, %v1122_v43 }
 0x73e   :  { %v830_v45 = vpop.xlane.xlu1 %829 }
 0x73f   :  { %1560 = vpow2.f32 %v1123_v44  ;;  %v1211_v44 = vsub.s32 %v2055_v59, %v1210_v36 }
 0x740   :  { %1562 = vlog2.f32 %v830_v45 }
 0x742   :  { %v928_v46 = vpop.xlane.xlu1 %927 }
 0x743   :  { %1564 = vlog2.f32 %v928_v46 }
 0x746   :  { %v1027_v47 = vpop.xlane.xlu1 %1026 }
 0x747   :  { %1566 = vlog2.f32 %v1027_v47 }
 0x749   :  { %v1561_v48 = vpop.eup %1560 }
 0x74a   :  { %v1563_v49 = vpop.eup %1562  ;;  %1125 = vadd.xlane.f32.xlu1 %v1561_v48 }
 0x74b   :  { %v832_v50 = vmul.f32 0.6931472, %v1563_v49 }
 0x74d   :  { %v1565_v51 = vpop.eup %1564  ;;  %v833_v52 = vadd.f32 %v832_v50, %v825_v22 }
 0x74e   :  { %v930_v53 = vmul.f32 0.6931472, %v1565_v51 }
 0x74f   :  { %v834_v54 = vsub.f32 %v2060_v60, %v833_v52 }
 0x750   :  { %v931_v55 = vadd.f32 %v930_v53, %v923_v25 }
 0x751   :  { %v1567_v56 = vpop.eup %1566  ;;  %835 = vst [vmem:[#allocation10] sm:$0xff] %v834_v54  ;;  %1137 = vmax.xlane.f32.xlu1 %v834_v54 }
 0x752   :  { %v932_v57 = vsub.f32 %v2065_v1, %v931_v55  ;;  %v1029_v38 = vmul.f32 0.6931472, %v1567_v56 }
 0x754   :  { %934 = vst [vmem:[#allocation10 + $0x8] sm:$0xff] %v932_v57  ;;  %v1030_v61 = vadd.f32 %v1029_v38, %v1022_v28 }
 0x755   :  { %1139 = vmax.xlane.f32.xlu1 %v932_v57 }
 0x756   :  { %v1031_v62 = vsub.f32 %v2076_v13, %v1030_v61 }
 0x758   :  { %1033 = vst [vmem:[#allocation10 + $0x10] sm:$0xff] %v1031_v62 }
 0x759   :  { %1141 = vmax.xlane.f32.xlu1 %v1031_v62 }
 0x7d7   :  { %v1126_v63 = vpop.xlane.xlu1 %1125 }
 0x7d8   :  { %1568 = vlog2.f32 %v1126_v63 }
 0x7de   :  { %v1138_v42 = vpop.xlane.xlu1 %1137 }
 0x7df   :  { %vm1145_vm3 = vcmp.eq.f32.partialorder %v834_v54, %v1138_v42 }
 0x7e0   :  { %v1149_v3 = vsel %vm1145_vm3, %v2055_v59, 128 }
 0x7e1   :  { %v1154_v6 = vshra.s32 %v1149_v3, 16  ;;  %v1153_v14 = vand.u32 65535, %v1149_v3 }
 0x7e2   :  { %v1569_v0 = vpop.eup %1568  ;;  %v1140_v60 = vpop.xlane.xlu1 %1139 }
 0x7e3   :  { %v1128_v2 = vmul.f32 0.6931472, %v1569_v0  ;;  %vm1146_vm4 = vcmp.eq.f32.partialorder %v932_v57, %v1140_v60  ;;  %v1156_v8 = vcvt.s32.f32 %v1154_v6  ;;  %v1155_v20 = vcvt.s32.f32 %v1153_v14 }
 0x7e4   :  { %v1150_v7 = vsel %vm1146_vm4, %v2055_v59, 128 }
 0x7e5   :  { %v1129_v4 = vadd.f32 %v1128_v2, %v1121_v41  ;;  %v1168_v9 = vshra.s32 %v1150_v7, 16  ;;  %v1167_v18 = vand.u32 65535, %v1150_v7 }
 0x7e6   :  { %v1142_v1 = vpop.xlane.xlu1 %1141 }
 0x7e7   :  { %v1130_v5 = vsub.f32 %v1119_v33, %v1129_v4  ;;  %vm1147_vm5 = vcmp.eq.f32.partialorder %v1031_v62, %v1142_v1  ;;  %v1170_v11 = vcvt.s32.f32 %v1168_v9  ;;  %v1169_v25 = vcvt.s32.f32 %v1167_v18 }
 0x7e8   :  { %v1151_v10 = vsel %vm1147_vm5, %v2055_v59, 128 }
 0x7e9   :  { %1132 = vst [vmem:[#allocation10 + $0x18] sm:$0xff] %v1130_v5  ;;  %1143 = vmax.xlane.f32.xlu1 %v1130_v5  ;;  %v1182_v12 = vshra.s32 %v1151_v10, 16  ;;  %v1181_v22 = vand.u32 65535, %v1151_v10 }
 0x7eb   :  { %v1184_v13 = vcvt.s32.f32 %v1182_v12  ;;  %v1183_v28 = vcvt.s32.f32 %v1181_v22 }
 0x7ed   :  { %1157 = vmin.xlane.f32.xlu1 %v1156_v8 }
 0x7f1   :  { %1171 = vmin.xlane.f32.xlu1 %v1170_v11 }
 0x7f5   :  { %1185 = vmin.xlane.f32.xlu1 %v1184_v13 }
 0x876   :  { %v1144_v15 = vpop.xlane.xlu1 %1143 }
 0x877   :  { %vm1148_vm6 = vcmp.eq.f32.partialorder %v1130_v5, %v1144_v15 }
 0x878   :  { %v1152_v16 = vsel %vm1148_vm6, %v2055_v59, 128 }
 0x879   :  { %v1196_v17 = vshra.s32 %v1152_v16, 16  ;;  %v1195_v30 = vand.u32 65535, %v1152_v16 }
 0x87a   :  { %v1158_v19 = vpop.xlane.xlu1 %1157 }
 0x87b   :  { %v1198_v21 = vcvt.s32.f32 %v1196_v17  ;;  %vm1159_vm7 = vcmp.eq.f32.partialorder %v1156_v8, %v1158_v19  ;;  %v1164_v31 = vcvt.f32.s32 %v1158_v19  ;;  %v1197_v34 = vcvt.s32.f32 %v1195_v30 }
 0x87c   :  { %v1160_v23 = vsel %vm1159_vm7, %v1155_v20, inf }
 0x87d   :  { %1199 = vmin.xlane.f32.xlu1 %v1198_v21  ;;  %1161 = vmin.xlane.f32.xlu0 %v1160_v23  ;;  %v1165_v40 = vshll.u32 %v1164_v31, 16 }
 0x87e   :  { %v1172_v24 = vpop.xlane.xlu1 %1171 }
 0x87f   :  { %vm1173_vm8 = vcmp.eq.f32.partialorder %v1170_v11, %v1172_v24  ;;  %v1178_v35 = vcvt.f32.s32 %v1172_v24 }
 0x880   :  { %v1174_v26 = vsel %vm1173_vm8, %v1169_v25, inf }
 0x881   :  { %1175 = vmin.xlane.f32.xlu1 %v1174_v26  ;;  %v1179_v43 = vshll.u32 %v1178_v35, 16 }
 0x882   :  { %v1186_v27 = vpop.xlane.xlu1 %1185 }
 0x883   :  { %vm1187_vm9 = vcmp.eq.f32.partialorder %v1184_v13, %v1186_v27 }
 0x884   :  { %v1188_v29 = vsel %vm1187_vm9, %v1183_v28, inf }
 0x885   :  { %1189 = vmin.xlane.f32.xlu1 %v1188_v29 }
 0x90a   :  { %v1162_v32 = vpop.xlane.xlu0 %1161  ;;  %v1200_v33 = vpop.xlane.xlu1 %1199 }
 0x90b   :  { %v1163_v37 = vcvt.f32.s32 %v1162_v32  ;;  %vm1201_vm10 = vcmp.eq.f32.partialorder %v1198_v21, %v1200_v33 }
 0x90c   :  { %v1202_v39 = vsel %vm1201_vm10, %v1197_v34, inf }
 0x90d   :  { %1203 = vmin.xlane.f32.xlu1 %v1202_v39  ;;  %v1166_v45 = vadd.s32 %v1165_v40, %v1163_v37 }
 0x90e   :  { %v1176_v41 = vpop.xlane.xlu1 %1175 }
 0x90f   :  { %v1177_v46 = vcvt.f32.s32 %v1176_v41  ;;  %v1212_v48 = vrot.slane %v1166_v45, %v1211_v44 }
 0x911   :  { %v1180_v47 = vadd.s32 %v1179_v43, %v1177_v46 }
 0x913   :  { %v1216_v49 = vrot.slane %v1180_v47, %v1211_v44 }
 0x915   :  { %v1226_v50 = vsel %vm1225_vm11, %v1216_v49, %v1212_v48 }
 0x916   :  { %1669 = shalt.err (!%p1666_p8)
}
 0x917   :  { %s1670_s16 = scalar_lea.hbm %s2131_s9, 512 }
 0x918   :  { %p1671_p9 = scmp.ne.s32.totalorder %s2131_s9, %s1670_s16  ;;  %p1674_p10 = scmp.lt.u32.totalorder %s1670_s16, %s2131_s9 }
 0x91a   :  { %p1676_p11 = pnand %p1674_p10, %p1671_p9 }
 0x91c   :  { %1679 = shalt.err (!%p1676_p11)
}
 0x91d   :  { %1244 = dma.vmem_to_hbm [thread:$0]  %s1239_s8, 512, %s2131_s9, [#allocation4], %s1714_s29, %s1714_s29, %s1715_s30   ;;  %v1190_v58 = vpop.xlane.xlu1 %1189  ;;  %v1192_v59 = vcvt.f32.s32 %v1186_v27  ;;  %v1206_v53 = vcvt.f32.s32 %v1200_v33  ;;  %vm1227_vm12 = vcmask 1042434   ;;  %vm1229_vm13 = vcmask 1043459  }
 0x91e   :  { %v1191_v51 = vcvt.f32.s32 %v1190_v58  ;;  %s1722_s23 = smov [#allocation11]   ;;  %vm1231_vm14 = vcmask 60416  }
 0x91f   :  { %v1193_v52 = vshll.u32 %v1192_v59, 16  ;;  %v1207_v56 = vshll.u32 %v1206_v53, 16  ;;  %s1251_s4 = sshll.u32 %s1722_s23, 4  ;;  %s1252_s4 = int_to_ptr.vmem [resolvable:$true] %s1251_s4 }
 0x920   :  { %s1680_s9 = scalar_lea.vmem %s1252_s4, 64  ;;  %p1685_p13 = scmp.lt.s32.totalorder %s1252_s4, %s1252_s4 }
 0x921   :  { %v1194_v54 = vadd.s32 %v1193_v52, %v1191_v51  ;;  %p1681_p12 = scmp.ne.s32.totalorder %s1252_s4, %s1680_s9  ;;  %p1686_p0 = scmp.lt.s32.totalorder %s1680_s9, %s1680_s9 }
 0x923   :  { %v1220_v38 = vrot.slane %v1194_v54, %v1211_v44  ;;  %p1687_p1 = por %p1686_p0, %p1685_p13 }
 0x925   :  { %v1228_v63 = vsel %vm1227_vm12, %v1220_v38, %v1226_v50  ;;  %p1688_p2 = pnand %p1687_p1, %p1681_p12 }
 0x99a   :  { %v1204_v55 = vpop.xlane.xlu1 %1203 }
 0x99b   :  { %v1205_v57 = vcvt.f32.s32 %v1204_v55 }
 0x99d   :  { %v1208_v61 = vadd.s32 %v1207_v56, %v1205_v57 }
 0x99f   :  { %v1224_v62 = vrot.slane %v1208_v61, %v1211_v44 }
 0x9a1   :  { %v1230_v42 = vsel %vm1229_vm13, %v1224_v62, %v1228_v63 }
 0x9a2   :  { %1232 = vst.msk [vmem:[#allocation11] sm:$0xf] %vm1231_vm14, %v1230_v42 }
 0x9a3   :  { %1691 = shalt.err (!%p1688_p2)
}
 0x9a4   :  { %s1692_s18 = scalar_lea.hbm %s2132_s10, 64 }
 0x9a5   :  { %p1693_p3 = scmp.ne.s32.totalorder %s2132_s10, %s1692_s18  ;;  %p1696_p4 = scmp.lt.u32.totalorder %s1692_s18, %s2132_s10 }
 0x9a7   :  { %p1698_p5 = pnand %p1696_p4, %p1693_p3 }
 0x9a9   :  { %1701 = shalt.err (!%p1698_p5)
}
 0x9aa   :  { %1254 = dma.vmem_to_hbm [thread:$0]  %s1252_s4, 64, %s2132_s10, [#allocation12]  }
 0x9ab   :  { %1708 = dma.done.wait [#allocation4], 512  }
 0x9ac   :  { %1709 = vsyncadd [#allocation4], 4294966784 }
 0x9ad   :  { %1710 = dma.done.wait [#allocation12], 64  }
 0x9ae   :  { %1711 = vsyncadd [#allocation12], 4294967232 }
 0x9af   :  { %1265 = vsyncpa [#allocation3], 1 }
 0x9b0   :  { %1266 = vsyncpa [#allocation6], 1 }
 0x9b1   :  { %1267 = vsyncpa [#allocation9], 1 }
 0x9b2   :  { %1268 = vsyncpa [#allocation4], 1 }
 0x9b3   :  { %1269 = vsyncpa [#allocation12], 1 }

</bundles_post_ra>
